<compile_context>
chip_gen: v5e
topology: v5e:2x2
jax: 0.10.0
libtpu: 0.0.40
codegen_flags: <defaults>
</compile_context>

<pallas_src>
import jax
import jax.numpy as jnp
from jax.experimental import pallas as pl
from jax.experimental.pallas import tpu as pltpu


def _linear_kernel(x_ref, w_ref, b_ref, o_ref, acc_ref):
    # x_ref: (tile_m, tile_k), w_ref: (tile_k, tile_n), b_ref: (1, tile_n)
    # o_ref: (tile_m, tile_n), acc_ref: (tile_m, tile_n) f32 scratch.
    k = pl.program_id(2)

    @pl.when(k == 0)
    def _init():
        acc_ref[...] = jnp.zeros_like(acc_ref)

    acc_ref[...] += jnp.dot(
        x_ref[...], w_ref[...], preferred_element_type=jnp.float32
    )

    @pl.when(k == pl.num_programs(2) - 1)
    def _finalize():
        # Bias is added (and cast) only once per output tile, in the epilogue.
        o_ref[...] = (
            acc_ref[...] + b_ref[...].astype(jnp.float32)
        ).astype(o_ref.dtype)


def _pick_tile_k(K, tk_max=1024):
    """Largest 128-multiple <= tk_max that divides K; else full K.

    Keeping tile_k an exact divisor of K (or the whole K) avoids ragged K
    blocks, which would contaminate the accumulator with garbage products.
    """
    if K <= tk_max:
        return K
    for cand in range(tk_max - tk_max % 128, 0, -128):
        if K % cand == 0:
            return cand
    return K  # rare fallback: whole K resident per weight tile


def encoder_with_fc(x, weight, bias, *, tile_m=256, tile_n=256, tile_k_max=1024):
    """y = x @ weight.T + bias, applied over the last dim of x.

    x:      (..., in_channels)
    weight: (hidden_size, in_channels)   -- PyTorch nn.Linear convention
    bias:   (hidden_size,)
    """
    in_channels = x.shape[-1]
    hidden_size = weight.shape[0]
    lead_shape = x.shape[:-1]

    x2d = x.reshape(-1, in_channels)      # (M, K)
    M, K = x2d.shape
    N = hidden_size

    w_kn = weight.T                       # (K, N)
    b_1n = bias.reshape(1, N)             # (1, N)

    # Tile selection.  Using the full dim when it is smaller than the default
    # tile keeps the BlockSpec legal ("block == full dim" rule) with no padding.
    tm = M if M <= tile_m else tile_m     # 256 is a multiple of 8/16/32 -> OK
    tn = N if N <= tile_n else tile_n     # multiple of 128 -> lane-dense vst
    tk = _pick_tile_k(K, tile_k_max)

    grid = (pl.cdiv(M, tm), pl.cdiv(N, tn), pl.cdiv(K, tk))

    y2d = pl.pallas_call(
        _linear_kernel,
        out_shape=jax.ShapeDtypeStruct((M, N), x.dtype),
        grid=grid,
        in_specs=[
            pl.BlockSpec((tm, tk), lambda i, j, k: (i, k)),   # x row/K tile
            pl.BlockSpec((tk, tn), lambda i, j, k: (k, j)),   # weight K/N tile
            pl.BlockSpec((1, tn), lambda i, j, k: (0, j)),    # bias N tile
        ],
        out_specs=pl.BlockSpec((tm, tn), lambda i, j, k: (i, j)),
        scratch_shapes=[pltpu.VMEM((tm, tn), jnp.float32)],
        compiler_params=pltpu.CompilerParams(
            dimension_semantics=("parallel", "parallel", "arbitrary"),
            vmem_limit_bytes=32 * 1024 * 1024,
        ),
    )(x2d, w_kn, b_1n)

    return y2d.reshape(*lead_shape, N)


def init_params(key, in_channels, hidden_size, dtype=jnp.float32):
    # Deterministic init matching nn.Linear's shapes (kaiming-uniform-ish range).
    kw, kb = jax.random.split(key)
    bound = 1.0 / jnp.sqrt(in_channels)
    weight = jax.random.uniform(
        kw, (hidden_size, in_channels), dtype, minval=-bound, maxval=bound
    )
    bias = jax.random.uniform(
        kb, (hidden_size,), dtype, minval=-bound, maxval=bound
    )
    return weight, bias


if __name__ == "__main__":
    key = jax.random.PRNGKey(0)
    k_x, k_p, k_x2, k_p2 = jax.random.split(key, 4)

    # Small shapes consistent with the module's forward (Linear over last dim).
    batch, seq, in_channels, hidden_size = 2, 8, 32, 64
    x = jax.random.normal(k_x, (batch, seq, in_channels), dtype=jnp.float32)
    weight, bias = init_params(k_p, in_channels, hidden_size)

    y = jax.block_until_ready(encoder_with_fc(x, weight, bias))
    y_ref = x @ weight.T + bias
    assert y.shape == (batch, seq, hidden_size)
    assert jnp.allclose(y, y_ref, atol=1e-4, rtol=1e-4)

    # A second case with ragged M/N tiles to exercise the 2-D output grid.
    b2, s2, c2, h2 = 3, 100, 96, 320
    x2 = jax.random.normal(k_x2, (b2, s2, c2), dtype=jnp.float32)
    w2, bb2 = init_params(k_p2, c2, h2)
    y2 = jax.block_until_ready(encoder_with_fc(x2, w2, bb2))
    y2_ref = x2 @ w2.T + bb2
    assert y2.shape == (b2, s2, h2)
    assert jnp.allclose(y2, y2_ref, atol=1e-4, rtol=1e-4)

    print("KERNEL_OK")
</pallas_src>

<mosaic_0001>
module attributes {stable_mosaic.version = 11 : i64} {
  func.func @_linear_kernel(%arg0: i32, %arg1: i32, %arg2: i32, %arg3: memref<16x32xf32, #tpu.memory_space<vmem>>, %arg4: memref<32x64xf32, #tpu.memory_space<vmem>>, %arg5: memref<1x64xf32, #tpu.memory_space<vmem>>, %arg6: memref<16x64xf32, #tpu.memory_space<vmem>>, %arg7: memref<16x64xf32, #tpu.memory_space<vmem>>) attributes {dimension_semantics = [#tpu.dimension_semantics<parallel>, #tpu.dimension_semantics<parallel>, #tpu.dimension_semantics<arbitrary>], iteration_bounds = array<i64: 1, 1, 1>, scalar_prefetch = 0 : i64, scratch_operands = 1 : i64, tpu.core_type = #tpu.core_type<tc>, window_params = [{transform_indices = @transform_0, window_bounds = array<i64: 16, 32>}, {transform_indices = @transform_1, window_bounds = array<i64: 32, 64>}, {transform_indices = @transform_2, window_bounds = array<i64: 1, 64>}, {transform_indices = @transform_3, window_bounds = array<i64: 16, 64>}]} {
    %c0_i32 = arith.constant 0 : i32
    %0 = arith.cmpi eq, %arg2, %c0_i32 : i32
    %1 = arith.extui %0 : i1 to i32
    %c0_i32_0 = arith.constant 0 : i32
    %2 = arith.cmpi ne, %1, %c0_i32_0 : i32
    scf.if %2 {
      %cst_10 = arith.constant 0.000000e+00 : f32
      %12 = vector.broadcast %cst_10 : f32 to vector<16x64xf32>
      %c0_11 = arith.constant 0 : index
      %c0_12 = arith.constant 0 : index
      %13 = vector.load %arg7[%c0_11, %c0_12] : memref<16x64xf32, #tpu.memory_space<vmem>>, vector<16x64xf32>
      tpu.vector_store %arg7[%c0_11, %c0_12], %12 {strides = array<i32>} : memref<16x64xf32, #tpu.memory_space<vmem>>, vector<16x64xf32>,
    } else {
    }
    %c0 = arith.constant 0 : index
    %c0_1 = arith.constant 0 : index
    %3 = vector.load %arg7[%c0, %c0_1] : memref<16x64xf32, #tpu.memory_space<vmem>>, vector<16x64xf32>
    %c0_2 = arith.constant 0 : index
    %c0_3 = arith.constant 0 : index
    %4 = vector.load %arg3[%c0_2, %c0_3] : memref<16x32xf32, #tpu.memory_space<vmem>>, vector<16x32xf32>
    %c0_4 = arith.constant 0 : index
    %c0_5 = arith.constant 0 : index
    %5 = vector.load %arg4[%c0_4, %c0_5] : memref<32x64xf32, #tpu.memory_space<vmem>>, vector<32x64xf32>
    %cst = arith.constant dense<0.000000e+00> : vector<16x64xf32>
    %6 = tpu.matmul %4, %5, %cst {dimension_numbers = #tpu.dot_dimension_numbers<[1], [0], [0], [1], [0, 0, 1, 1], [], []>} : vector<16x32xf32>, vector<32x64xf32>, vector<16x64xf32> -> vector<16x64xf32>
    %7 = arith.addf %3, %6 : vector<16x64xf32>
    %c0_6 = arith.constant 0 : index
    %c0_7 = arith.constant 0 : index
    %8 = vector.load %arg7[%c0_6, %c0_7] : memref<16x64xf32, #tpu.memory_space<vmem>>, vector<16x64xf32>
    tpu.vector_store %arg7[%c0_6, %c0_7], %7 {strides = array<i32>} : memref<16x64xf32, #tpu.memory_space<vmem>>, vector<16x64xf32>,
    %c0_i32_8 = arith.constant 0 : i32
    %9 = arith.cmpi eq, %arg2, %c0_i32_8 : i32
    %10 = arith.extui %9 : i1 to i32
    %c0_i32_9 = arith.constant 0 : i32
    %11 = arith.cmpi ne, %10, %c0_i32_9 : i32
    scf.if %11 {
      %c0_10 = arith.constant 0 : index
      %c0_11 = arith.constant 0 : index
      %12 = vector.load %arg7[%c0_10, %c0_11] : memref<16x64xf32, #tpu.memory_space<vmem>>, vector<16x64xf32>
      %c0_12 = arith.constant 0 : index
      %c0_13 = arith.constant 0 : index
      %13 = vector.load %arg5[%c0_12, %c0_13] : memref<1x64xf32, #tpu.memory_space<vmem>>, vector<1x64xf32>
      %14 = vector.broadcast %13 : vector<1x64xf32> to vector<16x64xf32>
      %15 = arith.addf %12, %14 : vector<16x64xf32>
      %c0_14 = arith.constant 0 : index
      %c0_15 = arith.constant 0 : index
      %16 = vector.load %arg6[%c0_14, %c0_15] : memref<16x64xf32, #tpu.memory_space<vmem>>, vector<16x64xf32>
      tpu.vector_store %arg6[%c0_14, %c0_15], %15 {strides = array<i32>} : memref<16x64xf32, #tpu.memory_space<vmem>>, vector<16x64xf32>,
    } else {
    }
    return
  }
  func.func @transform_0(%arg0: i32, %arg1: i32, %arg2: i32) -> (i32, i32) {
    %c0_i32 = arith.constant 0 : i32
    return %arg0, %arg2 : i32, i32
  }
  func.func @transform_1(%arg0: i32, %arg1: i32, %arg2: i32) -> (i32, i32) {
    %c0_i32 = arith.constant 0 : i32
    return %arg2, %arg1 : i32, i32
  }
  func.func @transform_2(%arg0: i32, %arg1: i32, %arg2: i32) -> (i32, i32) {
    %c0_i32 = arith.constant 0 : i32
    %c0_i32_0 = arith.constant 0 : i32
    return %c0_i32, %arg1 : i32, i32
  }
  func.func @transform_3(%arg0: i32, %arg1: i32, %arg2: i32) -> (i32, i32) {
    %c0_i32 = arith.constant 0 : i32
    return %arg0, %arg1 : i32, i32
  }
}

</mosaic_0001>

<bundles_post_ra>
// kernel: tpu_custom_call.1
= control target key start
LH: loop header
LB: loop body
LE: loop exit
PB: predicated region body
PF: predicated region fallthrough
CT: control target
= control target key end

     0   :  { %8 = vsyncpa [#allocation4], 0  ;;  %s274_s0 = inlined_call_operand.hbm [shape: f32[16,32], index: 0, kind: input, shape index: {}]   ;;  %s275_s1 = inlined_call_operand.hbm [shape: f32[32,64], index: 1, kind: input, shape index: {}]   ;;  %s276_s2 = inlined_call_operand.vmem [shape: f32[1,64], index: 2, kind: input, shape index: {}]   ;;  %s277_s3 = inlined_call_operand.hbm [shape: f32[16,64], index: 3, kind: output, shape index: {}]  }
   0x1   :  { %9 = vsyncpa [#allocation7], 0 }
   0x2   :  { %10 = vsyncpa [#allocation5], 0  ;;  %s15_s14 = sshll.u32 %s274_s0, 4  ;;  %s221_s15 = smov [#allocation3]   ;;  %s16_s14 = int_to_ptr.hbm [resolvable:$true] %s15_s14 }
   0x3   :  { %s17_s16 = sshll.u32 %s221_s15, 4  ;;  %s28_s19 = sshll.u32 %s275_s1, 4  ;;  %s18_s16 = int_to_ptr.vmem [resolvable:$true] %s17_s16  ;;  %s29_s19 = int_to_ptr.hbm [resolvable:$true] %s28_s19 }
   0x4   :  { %s222_s20 = smov 128   ;;  %s223_s21 = smov 8  }
   0x5   :  { %23 = dma.hbm_to_vmem [thread:$0]  %s16_s14, 256, %s18_s16, [#allocation4], %s222_s20, %s222_s20, %s223_s21  }
   0x6   :  { %s224_s22 = smov [#allocation6]  }
   0x7   :  { %s30_s23 = sshll.u32 %s224_s22, 4  ;;  %s31_s23 = int_to_ptr.vmem [resolvable:$true] %s30_s23 }
   0x8   :  { %36 = dma.hbm_to_vmem [thread:$0]  %s29_s19, 512, %s31_s23, [#allocation7], %s222_s20, %s222_s20, %s223_s21  }
   0x9   :  { %215 = dma.done.wait [#allocation4], 256  }
   0xa   :  { %216 = vsyncadd [#allocation4], 4294967040 }
   0xb   :  { %217 = dma.done.wait [#allocation7], 512  }
   0xc   :  { %218 = vsyncadd [#allocation7], 4294966784  ;;  %vm51_vm0 = vcmask 523264   ;;  %v225_v0 = vmov 0.0   ;;  %v61_v1 = vld [vmem:[#allocation6 + $0x18] sm:$0xff]  ;;  %v60_v2 = vld [vmem:[#allocation6 + $0x10] sm:$0xff] }
   0xd   :  { %52 = vst.msk [vmem:[#allocation2] sm:$0xff] %vm51_vm0, %v225_v0  ;;  %81 = vmatpush.msra.mxu0 %v61_v1  ;;  %132 = vmatpush.msra.mxu1 %v61_v1  ;;  %v59_v3 = vld [vmem:[#allocation6 + $0x8] sm:$0xff]  ;;  %v58_v4 = vld [vmem:[#allocation6] sm:$0xff]  ;;  %v56_v5 = vld [vmem:[#allocation3] sm:$0xff]  ;;  %vm62_vm1 = vcmask 261120   ;;  %s226_s24 = smov [#allocation8]  }
   0xe   :  { %53 = vst.msk [vmem:[#allocation2 + $0x8] sm:$0xff] %vm51_vm0, %v225_v0  ;;  %v57_v6 = vld [vmem:[#allocation3 + $0x8] sm:$0xff]  ;;  %v142_v13 = vld [vmem:[%s276_s2] ss:$0 sm:$0xff]  ;;  %s114_s25 = sshll.u32 %s226_s24, 4  ;;  %s116_s28 = sshll.u32 %s277_s3, 4  ;;  %s115_s25 = int_to_ptr.vmem [resolvable:$true] %s114_s25  ;;  %s117_s28 = int_to_ptr.hbm [resolvable:$true] %s116_s28 }
   0xf   :  { %82 = vmatpush.msra.mxu0 %v60_v2  ;;  %133 = vmatpush.msra.mxu1 %v60_v2 }
  0x11   :  { %83 = vmatpush.msra.mxu0 %v59_v3  ;;  %134 = vmatpush.msra.mxu1 %v59_v3 }
  0x13   :  { %84 = vmatpush.msra.mxu0 %v58_v4  ;;  %135 = vmatpush.msra.mxu1 %v58_v4 }
  0x14   :  { %130 = vmatmul.msk.f32.vlgmr.msra.gmra.mxu0 %vm62_vm1, %v56_v5  ;;  %131 = vmatmul.msk.f32.vlgmr.msra.gmra.mxu1 %vm62_vm1, %v57_v6  ;;  %v54_v7 = vld [vmem:[#allocation2] sm:$0xff] }
  0x15   :  { %v55_v8 = vld [vmem:[#allocation2 + $0x8] sm:$0xff] }
  0x91   :  { %v86_v9 = vpop.f32.mrf.mxu0  ;;  %v89_v10 = vpop.f32.mrf.mxu1 }
  0x92   :  { %v92_v11 = vadd.f32 %v86_v9, %v54_v7  ;;  %v93_v12 = vadd.f32 %v89_v10, %v55_v8 }
  0x94   :  { %95 = vst.msk [vmem:[#allocation2] sm:$0xff] %vm51_vm0, %v92_v11 }
  0x95   :  { %96 = vst.msk [vmem:[#allocation2 + $0x8] sm:$0xff] %vm51_vm0, %v93_v12 }
  0x9b   :  { %v100_v14 = vld [vmem:[#allocation2] sm:$0xff] }
  0x9c   :  { %v101_v15 = vld [vmem:[#allocation2 + $0x8] sm:$0xff]  ;;  %v106_v16 = vadd.f32 %v142_v13, %v100_v14 }
  0x9d   :  { %v107_v17 = vadd.f32 %v142_v13, %v101_v15 }
  0x9e   :  { %108 = vst.msk [vmem:[#allocation8] sm:$0xff] %vm51_vm0, %v106_v16 }
  0x9f   :  { %109 = vst.msk [vmem:[#allocation8 + $0x8] sm:$0xff] %vm51_vm0, %v107_v17 }
  0xa0   :  { %122 = dma.vmem_to_hbm [thread:$0]  %s115_s25, 256, %s117_s28, [#allocation5], %s222_s20, %s222_s20, %s223_s21  }
  0xa1   :  { %219 = dma.done.wait [#allocation5], 256  }
  0xa2   :  { %220 = vsyncadd [#allocation5], 4294967040 }
  0xa3   :  { %127 = vsyncpa [#allocation4], 1 }
  0xa4   :  { %128 = vsyncpa [#allocation7], 1 }
  0xa5   :  { %129 = vsyncpa [#allocation5], 1 }

</bundles_post_ra>
